<compile_context>
chip_gen: v6e
topology: v6e:2x2x1
jax: 0.10.0
libtpu: 0.0.40
codegen_flags: <defaults>
</compile_context>

<pallas_src>
import functools

import jax
import jax.numpy as jnp
from jax.experimental import pallas as pl
from jax.experimental.pallas import tpu as pltpu


# ---------------------------------------------------------------------------
# Kernels
# ---------------------------------------------------------------------------
def _consensus_kernel_2d(w_ref, x_ref, o_ref, *, n_seg, channels):
    """Lane-dense path (C % 128 == 0).

    w_ref: SMEM, (n_seg,) f32 segment weights (scalar prefetch)
    x_ref: VMEM, (bn, n_seg * channels) batch chunk, segments contiguous per row
    o_ref: VMEM, (bn, channels)
    """
    acc = w_ref[0] * x_ref[:, 0:channels].astype(jnp.float32)
    for t in range(1, n_seg):  # n_seg is small & static -> fully unrolled
        acc = acc + w_ref[t] * x_ref[:, t * channels:(t + 1) * channels].astype(jnp.float32)
    o_ref[...] = acc.astype(o_ref.dtype)


def _consensus_kernel_3d(w_ref, x_ref, o_ref, *, n_seg):
    """Fallback path (C not a multiple of 128).

    w_ref: SMEM, (n_seg,) f32
    x_ref: VMEM, (bn, n_seg, C)
    o_ref: VMEM, (bn, C)
    """
    acc = w_ref[0] * x_ref[:, 0, :].astype(jnp.float32)
    for t in range(1, n_seg):
        acc = acc + w_ref[t] * x_ref[:, t, :].astype(jnp.float32)
    o_ref[...] = acc.astype(o_ref.dtype)


# ---------------------------------------------------------------------------
# Block-size selection
# ---------------------------------------------------------------------------
def _choose_block_n(n, t, c, itemsize, *, target_block_bytes=4 << 20, min_grid=8):
    """Pick the batch-chunk size bn for one grid step.

    Targets ~4 MiB of input per step (streaming kernels are at ~85% of HBM
    roofline by then), keeps >= min_grid steps (>= 4 per v7x TensorCore) when
    the batch allows it, and keeps bn a multiple of the sublane quantum so
    every block is sublane-dense and satisfies the (8, 128) BlockSpec rule.
    """
    quantum = max(8, 32 // itemsize)  # 8 for f32, 16 for bf16, 32 for 1-byte
    if n <= quantum:
        return n  # tiny batch: one full-array block (dims equal array -> OK)

    bn = max(1, int(target_block_bytes // max(1, t * c * itemsize)))
    grid_cap = -(-n // min_grid)  # cdiv(n, min_grid)
    if grid_cap >= quantum:       # only enforce many steps if bn stays dense
        bn = min(bn, grid_cap)
    bn = max(quantum, (bn // quantum) * quantum)
    return min(bn, n)


# ---------------------------------------------------------------------------
# Wrapper
# ---------------------------------------------------------------------------
def linear_consensus(x, weight, *, target_block_bytes=4 << 20):
    """x: (N, T, C, 1, 1) or (N, T, C);  weight: (1, T) = nn.Linear(T, 1).weight.

    Returns (N, 1, C, 1, 1), matching LinearConsensus.forward.
    """
    if x.ndim == 5:
        N, T, C = x.shape[:3]
        x3 = x.reshape(N, T, C)
    elif x.ndim == 3:
        N, T, C = x.shape
        x3 = x
    else:
        raise ValueError(f"expected rank-3 or rank-5 input, got shape {x.shape}")

    # nn.Linear(T, 1, bias=False).weight is (1, T); keep it as a tiny (T,)
    # f32 scalar-prefetch array that lands in SMEM (no broadcast, no HBM copy).
    w = jnp.asarray(weight, jnp.float32).reshape(T)

    itemsize = x3.dtype.itemsize
    bn = _choose_block_n(N, T, C, itemsize, target_block_bytes=target_block_bytes)
    grid = (pl.cdiv(N, bn),)

    # 4 MiB blocks double-buffer comfortably inside every generation's default
    # scoped-VMEM limit; only raise (and cap well under v7x's 64 MiB) if a
    # single batch row is pathologically large.
    block_bytes = bn * (T * C + C) * itemsize
    vmem_need = 2 * block_bytes + (1 << 20)
    vmem_limit = int(min(vmem_need, 32 << 20)) if vmem_need > (16 << 20) else None

    if C % 128 == 0:
        # Fully lane/sublane-dense 2D layout; per-t slices are tile-aligned views.
        kernel = functools.partial(_consensus_kernel_2d, n_seg=T, channels=C)
        x_in = x3.reshape(N, T * C)  # free: row-major contiguous
        in_spec = pl.BlockSpec((bn, T * C), lambda i, w_ref: (i, 0))
    else:
        # TODO(synk): for large-N models with C not a multiple of 128, folding
        # channels into a lane-dense slab would remove the lane padding; kept
        # simple here since the fallback output block is already sublane-dense.
        kernel = functools.partial(_consensus_kernel_3d, n_seg=T)
        x_in = x3
        in_spec = pl.BlockSpec((bn, T, C), lambda i, w_ref: (i, 0, 0))

    out2 = pl.pallas_call(
        kernel,
        out_shape=jax.ShapeDtypeStruct((N, C), x3.dtype),
        grid_spec=pltpu.PrefetchScalarGridSpec(
            num_scalar_prefetch=1,
            grid=grid,
            in_specs=[in_spec],
            out_specs=pl.BlockSpec((bn, C), lambda i, w_ref: (i, 0)),
        ),
        compiler_params=pltpu.CompilerParams(
            dimension_semantics=("parallel",),
            vmem_limit_bytes=vmem_limit,
        ),
    )(w, x_in)

    return out2.reshape(N, 1, C, 1, 1)


# ---------------------------------------------------------------------------
# Pure-JAX reference (mirrors the PyTorch module, n_seg > 1 path)
# ---------------------------------------------------------------------------
def linear_consensus_ref(x, weight):
    N, T, C = x.shape[:3]
    y = x.reshape(N, T, C).transpose(0, 2, 1)   # squeeze + permute -> (N, C, T)
    y = y @ jnp.asarray(weight, jnp.float32).T  # Linear(T -> 1, no bias)
    y = y.transpose(0, 2, 1)[..., None, None]   # (N, 1, C, 1, 1)
    return y.astype(x.dtype)


if __name__ == "__main__":
    key = jax.random.PRNGKey(0)
    kx, kw, kx2 = jax.random.split(key, 3)

    # Small shapes consistent with the temporal consensus head:
    # batch=2, num_segments=8, channels=32, pooled spatial 1x1.
    N, T, C = 2, 8, 32
    x = jax.random.normal(kx, (N, T, C, 1, 1), dtype=jnp.float32)
    # nn.Linear(n_seg, 1, bias=False).weight has shape (1, n_seg)
    weight = jax.random.normal(kw, (1, T), dtype=jnp.float32) / jnp.sqrt(T)

    out = jax.block_until_ready(linear_consensus(x, weight))
    ref = linear_consensus_ref(x, weight)
    assert out.shape == (N, 1, C, 1, 1), out.shape
    assert jnp.allclose(out, ref, atol=1e-5, rtol=1e-5), float(jnp.max(jnp.abs(out - ref)))

    # Also exercise the lane-dense 2D path (C a multiple of 128).
    N2, C2 = 16, 128
    x2 = jax.random.normal(kx2, (N2, T, C2, 1, 1), dtype=jnp.float32)
    out2 = jax.block_until_ready(linear_consensus(x2, weight))
    ref2 = linear_consensus_ref(x2, weight)
    assert out2.shape == (N2, 1, C2, 1, 1), out2.shape
    assert jnp.allclose(out2, ref2, atol=1e-5, rtol=1e-5), float(jnp.max(jnp.abs(out2 - ref2)))

    print("KERNEL_OK")
</pallas_src>

<mosaic_0001>
module attributes {stable_mosaic.version = 11 : i64} {
  func.func @_consensus_kernel_3d(%arg0: i32, %arg1: memref<8xf32, #tpu.memory_space<smem>>, %arg2: memref<2x8x32xf32, #tpu.memory_space<vmem>>, %arg3: memref<2x32xf32, #tpu.memory_space<vmem>>) attributes {dimension_semantics = [#tpu.dimension_semantics<parallel>], iteration_bounds = array<i64: 1>, scalar_prefetch = 1 : i64, scratch_operands = 0 : i64, tpu.core_type = #tpu.core_type<tc>, window_params = [{transform_indices = @transform_0, window_bounds = array<i64: 2, 8, 32>}, {transform_indices = @transform_1, window_bounds = array<i64: 2, 32>}]} {
    %c0 = arith.constant 0 : index
    %0 = memref.load %arg1[%c0] : memref<8xf32, #tpu.memory_space<smem>>
    %c0_0 = arith.constant 0 : index
    %c0_1 = arith.constant 0 : index
    %c0_2 = arith.constant 0 : index
    %1 = vector.load %arg2[%c0_0, %c0_1, %c0_2] : memref<2x8x32xf32, #tpu.memory_space<vmem>>, vector<2x1x32xf32>
    %2 = vector.shape_cast %1 : vector<2x1x32xf32> to vector<2x32xf32>
    %3 = vector.broadcast %0 : f32 to vector<2x32xf32>
    %4 = arith.mulf %3, %2 : vector<2x32xf32>
    %c1 = arith.constant 1 : index
    %5 = memref.load %arg1[%c1] : memref<8xf32, #tpu.memory_space<smem>>
    %c0_3 = arith.constant 0 : index
    %c1_4 = arith.constant 1 : index
    %c0_5 = arith.constant 0 : index
    %6 = vector.load %arg2[%c0_3, %c1_4, %c0_5] : memref<2x8x32xf32, #tpu.memory_space<vmem>>, vector<2x1x32xf32>
    %7 = vector.shape_cast %6 : vector<2x1x32xf32> to vector<2x32xf32>
    %8 = vector.broadcast %5 : f32 to vector<2x32xf32>
    %9 = arith.mulf %8, %7 : vector<2x32xf32>
    %10 = arith.addf %4, %9 : vector<2x32xf32>
    %c2 = arith.constant 2 : index
    %11 = memref.load %arg1[%c2] : memref<8xf32, #tpu.memory_space<smem>>
    %c0_6 = arith.constant 0 : index
    %c2_7 = arith.constant 2 : index
    %c0_8 = arith.constant 0 : index
    %12 = vector.load %arg2[%c0_6, %c2_7, %c0_8] : memref<2x8x32xf32, #tpu.memory_space<vmem>>, vector<2x1x32xf32>
    %13 = vector.shape_cast %12 : vector<2x1x32xf32> to vector<2x32xf32>
    %14 = vector.broadcast %11 : f32 to vector<2x32xf32>
    %15 = arith.mulf %14, %13 : vector<2x32xf32>
    %16 = arith.addf %10, %15 : vector<2x32xf32>
    %c3 = arith.constant 3 : index
    %17 = memref.load %arg1[%c3] : memref<8xf32, #tpu.memory_space<smem>>
    %c0_9 = arith.constant 0 : index
    %c3_10 = arith.constant 3 : index
    %c0_11 = arith.constant 0 : index
    %18 = vector.load %arg2[%c0_9, %c3_10, %c0_11] : memref<2x8x32xf32, #tpu.memory_space<vmem>>, vector<2x1x32xf32>
    %19 = vector.shape_cast %18 : vector<2x1x32xf32> to vector<2x32xf32>
    %20 = vector.broadcast %17 : f32 to vector<2x32xf32>
    %21 = arith.mulf %20, %19 : vector<2x32xf32>
    %22 = arith.addf %16, %21 : vector<2x32xf32>
    %c4 = arith.constant 4 : index
    %23 = memref.load %arg1[%c4] : memref<8xf32, #tpu.memory_space<smem>>
    %c0_12 = arith.constant 0 : index
    %c4_13 = arith.constant 4 : index
    %c0_14 = arith.constant 0 : index
    %24 = vector.load %arg2[%c0_12, %c4_13, %c0_14] : memref<2x8x32xf32, #tpu.memory_space<vmem>>, vector<2x1x32xf32>
    %25 = vector.shape_cast %24 : vector<2x1x32xf32> to vector<2x32xf32>
    %26 = vector.broadcast %23 : f32 to vector<2x32xf32>
    %27 = arith.mulf %26, %25 : vector<2x32xf32>
    %28 = arith.addf %22, %27 : vector<2x32xf32>
    %c5 = arith.constant 5 : index
    %29 = memref.load %arg1[%c5] : memref<8xf32, #tpu.memory_space<smem>>
    %c0_15 = arith.constant 0 : index
    %c5_16 = arith.constant 5 : index
    %c0_17 = arith.constant 0 : index
    %30 = vector.load %arg2[%c0_15, %c5_16, %c0_17] : memref<2x8x32xf32, #tpu.memory_space<vmem>>, vector<2x1x32xf32>
    %31 = vector.shape_cast %30 : vector<2x1x32xf32> to vector<2x32xf32>
    %32 = vector.broadcast %29 : f32 to vector<2x32xf32>
    %33 = arith.mulf %32, %31 : vector<2x32xf32>
    %34 = arith.addf %28, %33 : vector<2x32xf32>
    %c6 = arith.constant 6 : index
    %35 = memref.load %arg1[%c6] : memref<8xf32, #tpu.memory_space<smem>>
    %c0_18 = arith.constant 0 : index
    %c6_19 = arith.constant 6 : index
    %c0_20 = arith.constant 0 : index
    %36 = vector.load %arg2[%c0_18, %c6_19, %c0_20] : memref<2x8x32xf32, #tpu.memory_space<vmem>>, vector<2x1x32xf32>
    %37 = vector.shape_cast %36 : vector<2x1x32xf32> to vector<2x32xf32>
    %38 = vector.broadcast %35 : f32 to vector<2x32xf32>
    %39 = arith.mulf %38, %37 : vector<2x32xf32>
    %40 = arith.addf %34, %39 : vector<2x32xf32>
    %c7 = arith.constant 7 : index
    %41 = memref.load %arg1[%c7] : memref<8xf32, #tpu.memory_space<smem>>
    %c0_21 = arith.constant 0 : index
    %c7_22 = arith.constant 7 : index
    %c0_23 = arith.constant 0 : index
    %42 = vector.load %arg2[%c0_21, %c7_22, %c0_23] : memref<2x8x32xf32, #tpu.memory_space<vmem>>, vector<2x1x32xf32>
    %43 = vector.shape_cast %42 : vector<2x1x32xf32> to vector<2x32xf32>
    %44 = vector.broadcast %41 : f32 to vector<2x32xf32>
    %45 = arith.mulf %44, %43 : vector<2x32xf32>
    %46 = arith.addf %40, %45 : vector<2x32xf32>
    %c0_24 = arith.constant 0 : index
    %c0_25 = arith.constant 0 : index
    %47 = vector.load %arg3[%c0_24, %c0_25] : memref<2x32xf32, #tpu.memory_space<vmem>>, vector<2x32xf32>
    tpu.vector_store %arg3[%c0_24, %c0_25], %46 {strides = array<i32>} : memref<2x32xf32, #tpu.memory_space<vmem>>, vector<2x32xf32>,
    return
  }
  func.func @transform_0(%arg0: i32, %arg1: memref<8xf32, #tpu.memory_space<smem>>) -> (i32, i32, i32) {
    %c0_i32 = arith.constant 0 : i32
    %c0_i32_0 = arith.constant 0 : i32
    %c0_i32_1 = arith.constant 0 : i32
    return %arg0, %c0_i32, %c0_i32_0 : i32, i32, i32
  }
  func.func @transform_1(%arg0: i32, %arg1: memref<8xf32, #tpu.memory_space<smem>>) -> (i32, i32) {
    %c0_i32 = arith.constant 0 : i32
    %c0_i32_0 = arith.constant 0 : i32
    return %arg0, %c0_i32 : i32, i32
  }
}

</mosaic_0001>

<bundles_post_ra>
// kernel: tpu_custom_call.1
= control target key start
LH: loop header
LB: loop body
LE: loop exit
PB: predicated region body
PF: predicated region fallthrough
CT: control target
= control target key end

     0   :  { %s179_s9 = smov [#allocation3]   ;;  %s214_s0 = inlined_call_operand.hbm [shape: f32[8], index: 0, kind: input, shape index: {}]   ;;  %s215_s1 = inlined_call_operand.hbm [shape: f32[2,8,32], index: 1, kind: input, shape index: {}]   ;;  %s216_s2 = inlined_call_operand.hbm [shape: f32[2,32], index: 2, kind: output, shape index: {}]  }
   0x1   :  { %8 = dma.hbm_to_smem %s214_s0, 16, %s179_s9, [#allocation2] }
   0x2   :  { %173 = dma.done.wait [#allocation2], 16 }
   0x3   :  { %174 = vsyncadd [#allocation2], 4294967280 }
   0x4   :  { %10 = sfence }
   0x5   :  { %11 = vsyncpa [#allocation5], 0 }
   0x6   :  { %12 = vsyncpa [#allocation6], 0  ;;  %s180_s12 = smov [#allocation4]  }
   0x7   :  { %s18_s13 = sshll.u32 %s180_s12, 4  ;;  %s19_s13 = int_to_ptr.vmem [resolvable:$true] %s18_s13 }
   0x8   :  { %s141_s14 = scalar_lea.vmem %s19_s13, 256  ;;  %p146_p1 = scmp.lt.s32.totalorder %s19_s13, %s19_s13 }
   0x9   :  { %p142_p0 = scmp.ne.s32.totalorder %s19_s13, %s141_s14  ;;  %p147_p2 = scmp.lt.s32.totalorder %s141_s14, %s141_s14 }
   0xb   :  { %p148_p3 = por %p147_p2, %p146_p1 }
   0xd   :  { %p149_p4 = pnand %p148_p3, %p142_p0 }
   0xf   :  { %152 = shalt.err (!%p149_p4)
}
  0x10   :  { %s181_s15 = smov 128   ;;  %s182_s16 = smov 8  }
  0x11   :  { %24 = dma.hbm_to_vmem [thread:$0]  %s215_s1, 256, %s19_s13, [#allocation5], %s181_s15, %s181_s15, %s182_s16  }
  0x12   :  { %175 = dma.done.wait [#allocation5], 256  }
  0x13   :  { %176 = vsyncadd [#allocation5], 4294967040  ;;  %s28_s0 = sld [smem:[#allocation3]]  ;;  %v29_v0 = vld [vmem:[#allocation4] sm:$0x1]  ;;  %s183_s25 = smov [#allocation7]  }
  0x14   :  { %s113_s19 = sld [smem:[#allocation3 + $0x1]]  ;;  %v30_v1 = vld [vmem:[#allocation4 + $0x8] sm:$0x1]  ;;  %v35_v3 = vld [vmem:[#allocation4 + $0x1] sm:$0x1]  ;;  %s104_s26 = sshll.u32 %s183_s25, 4  ;;  %s105_s26 = int_to_ptr.vmem [resolvable:$true] %s104_s26 }
  0x15   :  { %s114_s20 = sld [smem:[#allocation3 + $0x2]]  ;;  %v36_v6 = vld [vmem:[#allocation4 + $0x9] sm:$0x1]  ;;  %v43_v8 = vld [vmem:[#allocation4 + $0x2] sm:$0x1]  ;;  %vm93_vm0 = vcmask 1041409   ;;  %p158_p6 = scmp.lt.s32.totalorder %s105_s26, %s105_s26 }
  0x16   :  { %s115_s21 = sld [smem:[#allocation3 + $0x3]]  ;;  %v44_v9 = vld [vmem:[#allocation4 + $0xa] sm:$0x1]  ;;  %v51_v13 = vld [vmem:[#allocation4 + $0x3] sm:$0x1]  ;;  %vm96_vm1 = vcmask 254976  }
  0x17   :  { %s205_s22 = sld [smem:[#allocation3 + $0x4]]  ;;  %v52_v14 = vld [vmem:[#allocation4 + $0xb] sm:$0x1]  ;;  %v59_v18 = vld [vmem:[#allocation4 + $0x4] sm:$0x1]  ;;  %s153_s27 = scalar_lea.vmem %s105_s26, 32 }
  0x18   :  { %s207_s23 = sld [smem:[#allocation3 + $0x5]]  ;;  %v60_v19 = vld [vmem:[#allocation4 + $0xc] sm:$0x1]  ;;  %v67_v25 = vld [vmem:[#allocation4 + $0x5] sm:$0x1]  ;;  %p154_p5 = scmp.ne.s32.totalorder %s105_s26, %s153_s27 }
  0x19   :  { %v31_v2 = vstv %s28_s0  ;;  %s118_s1 = sld [smem:[#allocation3 + $0x6]]  ;;  %v68_v26 = vld [vmem:[#allocation4 + $0xd] sm:$0x1]  ;;  %v75_v36 = vld [vmem:[#allocation4 + $0x6] sm:$0x1]  ;;  %p159_p7 = scmp.lt.s32.totalorder %s153_s27, %s153_s27 }
  0x1a   :  { %v32_v4 = vmul.f32 %v31_v2, %v29_v0  ;;  %v33_v5 = vmul.f32 %v31_v2, %v30_v1  ;;  %v37_v7 = vstv %s113_s19  ;;  %s119_s24 = sld [smem:[#allocation3 + $0x7]]  ;;  %v76_v37 = vld [vmem:[#allocation4 + $0xe] sm:$0x1]  ;;  %v83_v38 = vld [vmem:[#allocation4 + $0x7] sm:$0x1] }
  0x1b   :  { %v38_v10 = vmul.f32 %v37_v7, %v35_v3  ;;  %v39_v11 = vmul.f32 %v37_v7, %v36_v6  ;;  %v45_v12 = vstv %s114_s20  ;;  %v84_v39 = vld [vmem:[#allocation4 + $0xf] sm:$0x1]  ;;  %p160_p8 = por %p159_p7, %p158_p6 }
  0x1c   :  { %v46_v15 = vmul.f32 %v45_v12, %v43_v8  ;;  %v47_v16 = vmul.f32 %v45_v12, %v44_v9  ;;  %v53_v17 = vstv %s115_s21 }
  0x1d   :  { %v40_v20 = vadd.f32 %v38_v10, %v32_v4  ;;  %v41_v21 = vadd.f32 %v39_v11, %v33_v5  ;;  %v54_v22 = vmul.f32 %v53_v17, %v51_v13  ;;  %v55_v23 = vmul.f32 %v53_v17, %v52_v14  ;;  %p161_p9 = pnand %p160_p8, %p154_p5 }
  0x1e   :  { %v61_v24 = vstv %s205_s22  ;;  %v69_v27 = vstv %s207_s23 }
  0x1f   :  { %v48_v28 = vadd.f32 %v46_v15, %v40_v20  ;;  %v49_v29 = vadd.f32 %v47_v16, %v41_v21  ;;  %v62_v30 = vmul.f32 %v61_v24, %v59_v18  ;;  %v63_v31 = vmul.f32 %v61_v24, %v60_v19 }
  0x20   :  { %v70_v34 = vmul.f32 %v69_v27, %v67_v25  ;;  %v71_v35 = vmul.f32 %v69_v27, %v68_v26  ;;  %v77_v42 = vstv %s118_s1  ;;  %v85_v45 = vstv %s119_s24 }
  0x21   :  { %v56_v32 = vadd.f32 %v54_v22, %v48_v28  ;;  %v57_v33 = vadd.f32 %v55_v23, %v49_v29  ;;  %v78_v43 = vmul.f32 %v77_v42, %v75_v36  ;;  %v79_v44 = vmul.f32 %v77_v42, %v76_v37 }
  0x22   :  { %v86_v48 = vmul.f32 %v85_v45, %v83_v38  ;;  %v87_v49 = vmul.f32 %v85_v45, %v84_v39 }
  0x23   :  { %v64_v40 = vadd.f32 %v62_v30, %v56_v32  ;;  %v65_v41 = vadd.f32 %v63_v31, %v57_v33 }
  0x25   :  { %v72_v46 = vadd.f32 %v70_v34, %v64_v40  ;;  %v73_v47 = vadd.f32 %v71_v35, %v65_v41 }
  0x27   :  { %v80_v50 = vadd.f32 %v78_v43, %v72_v46  ;;  %v81_v51 = vadd.f32 %v79_v44, %v73_v47 }
  0x29   :  { %v88_v52 = vadd.f32 %v86_v48, %v80_v50  ;;  %v89_v53 = vadd.f32 %v87_v49, %v81_v51 }
  0x2b   :  { %v92_v54 = vrot.slane %v89_v53, 7 }
  0x2d   :  { %v94_v55 = vsel %vm93_vm0, %v92_v54, %v88_v52 }
  0x2e   :  { %97 = vst.msk [vmem:[#allocation7] sm:$0x3] %vm96_vm1, %v94_v55 }
  0x2f   :  { %164 = shalt.err (!%p161_p9)
}
  0x30   :  { %107 = dma.vmem_to_hbm [thread:$0]  %s105_s26, 32, %s216_s2, [#allocation6]  }
  0x31   :  { %177 = dma.done.wait [#allocation6], 32  }
  0x32   :  { %178 = vsyncadd [#allocation6], 4294967264 }
  0x33   :  { %111 = vsyncpa [#allocation5], 1 }
  0x34   :  { %112 = vsyncpa [#allocation6], 1 }

</bundles_post_ra>
